<compile_context>
chip_gen: v7x
topology: tpu7x:2x2x1
jax: 0.10.0
libtpu: 0.0.40
codegen_flags: <defaults>
</compile_context>

<pallas_src>
import math

import jax
import jax.numpy as jnp
from jax.experimental import pallas as pl
from jax.experimental.pallas import tpu as pltpu

_LANE = 128
_TARGET_BLOCK_BYTES = 2 * 1024 * 1024      # ~2 MiB per input tile
_VMEM_LIMIT_BYTES = 48 * 1024 * 1024       # < v7x 64 MiB physical VMEM


def _store(x, xf, scale, o_ref):
    # f32 math for mean/scale; bf16 inputs multiply/store in bf16 (halves vreg
    # pressure on v6e/v7x; still lowers correctly on v5e).
    if x.dtype == jnp.bfloat16:
        o_ref[...] = x * scale.astype(jnp.bfloat16)
    else:
        o_ref[...] = (xf * scale).astype(o_ref.dtype)


def _basic_norm_kernel(eps_ref, x_ref, o_ref):
    """Standard path: last dim of the block == d_model."""
    x = x_ref[...]
    xf = x.astype(jnp.float32)
    mean_sq = jnp.mean(xf * xf, axis=-1, keepdims=True)
    scale = jax.lax.rsqrt(mean_sq + eps_ref[0])          # eps_ref holds exp(eps_param)
    _store(x, xf, scale, o_ref)


def _basic_norm_packed_kernel(eps_ref, x_ref, seg_ref, o_ref):
    """Packed path (d_model < 128, d_model | 128): each 128-lane row holds
    128/d_model logical rows. seg_ref is a (128, 128) block-diagonal matrix of
    1/d_model entries, so (x*x) @ seg yields, in every lane, the mean of x**2
    over that lane's d_model-wide segment (segmented mean, already broadcast
    back over each segment)."""
    x = x_ref[...]
    xf = x.astype(jnp.float32)
    # One small MXU matmul per tile; negligible vs. the HBM stream and keeps
    # the reduction exact per logical row (f32 accumulation).
    mean_sq = jnp.dot(xf * xf, seg_ref[...], preferred_element_type=jnp.float32)
    scale = jax.lax.rsqrt(mean_sq + eps_ref[0])
    _store(x, xf, scale, o_ref)


def _choose_block_rows(total_rows, row_bytes, target_bytes=_TARGET_BLOCK_BYTES):
    """Largest row-block (multiple of 16; multiple of 256 when large) whose
    input tile stays around `target_bytes`; one full-array block if it fits."""
    cand = max(16, (target_bytes // max(row_bytes, 1)) // 16 * 16)
    if cand >= 256:
        cand -= cand % 256
    if cand >= total_rows:
        return total_rows          # block dim == full array dim is always legal
    return cand


def balanced_basic_norm(x, eps_param, *, embedding=None):
    """Forward pass of BalancedBasicNorm.

    x:         [..., d_model] array (channel-last).
    eps_param: scalar, the learnable log-eps parameter.
    embedding: passed through untouched (mirrors the tuple-handling branch).
    """
    orig_shape = x.shape
    d_model = orig_shape[-1]
    rows = math.prod(orig_shape[:-1]) if len(orig_shape) > 1 else 1

    # exp(eps) computed once on the XLA side; kernel reads an SMEM scalar.
    eps_arr = jnp.exp(jnp.asarray(eps_param, jnp.float32)).reshape((1,))

    compiler_params = pltpu.CompilerParams(
        dimension_semantics=("parallel",),
        vmem_limit_bytes=_VMEM_LIMIT_BYTES,
    )
    smem_spec = pl.BlockSpec(memory_space=pltpu.MemorySpace.SMEM)

    use_packed = (
        d_model < _LANE
        and _LANE % d_model == 0
        and (rows * d_model) % _LANE == 0
    )

    if use_packed:
        pack = _LANE // d_model
        packed_rows = (rows * d_model) // _LANE
        x2 = x.reshape(packed_rows, _LANE)        # contiguous reshape: no HBM copy
        seg = jnp.kron(
            jnp.eye(pack, dtype=jnp.float32),
            jnp.ones((d_model, d_model), jnp.float32),
        ) * (1.0 / d_model)
        block_rows = _choose_block_rows(packed_rows, _LANE * x2.dtype.itemsize)
        out = pl.pallas_call(
            _basic_norm_packed_kernel,
            out_shape=jax.ShapeDtypeStruct((packed_rows, _LANE), x.dtype),
            grid=(pl.cdiv(packed_rows, block_rows),),
            in_specs=[
                smem_spec,                                               # exp(eps)
                pl.BlockSpec((block_rows, _LANE), lambda i: (i, 0)),     # packed x
                pl.BlockSpec((_LANE, _LANE), lambda i: (0, 0)),          # seg matrix
            ],
            out_specs=pl.BlockSpec((block_rows, _LANE), lambda i: (i, 0)),
            compiler_params=compiler_params,
        )(eps_arr, x2, seg)
    else:
        x2 = x.reshape(rows, d_model)
        block_rows = _choose_block_rows(rows, d_model * x2.dtype.itemsize)
        out = pl.pallas_call(
            _basic_norm_kernel,
            out_shape=jax.ShapeDtypeStruct((rows, d_model), x.dtype),
            grid=(pl.cdiv(rows, block_rows),),
            in_specs=[
                smem_spec,                                               # exp(eps)
                pl.BlockSpec((block_rows, d_model), lambda i: (i, 0)),
            ],
            out_specs=pl.BlockSpec((block_rows, d_model), lambda i: (i, 0)),
            compiler_params=compiler_params,
        )(eps_arr, x2)

    out = out.reshape(orig_shape)
    if embedding is not None:
        return out, embedding
    return out


def balanced_basic_norm_ref(x, eps_param):
    """Plain-JAX reference of the PyTorch forward."""
    xf = x.astype(jnp.float32)
    scales = (jnp.mean(xf * xf, axis=-1, keepdims=True) + jnp.exp(eps_param)) ** -0.5
    return (xf * scales).astype(x.dtype)


if __name__ == "__main__":
    eps = 1e-5
    eps_param = jnp.log(jnp.asarray(eps, jnp.float32))   # matches torch.tensor(eps).log()

    key = jax.random.PRNGKey(0)
    k1, k2, k3 = jax.random.split(key, 3)

    # 1) Packed (lane-dense) path: d_model=32 < 128.  [batch, seq, d_model]
    x = jax.random.normal(k1, (2, 16, 32), dtype=jnp.float32)
    out = jax.block_until_ready(balanced_basic_norm(x, eps_param))
    ref = balanced_basic_norm_ref(x, eps_param)
    assert out.shape == x.shape and out.dtype == x.dtype
    # Tolerance slightly loose only to allow a reduced-precision default MXU
    # pass in the segmented-mean matmul; typically exact to ~1e-6.
    assert jnp.allclose(out, ref, atol=1e-4, rtol=5e-3), "packed f32 mismatch"

    # 2) Standard path: d_model=256 >= 128.
    xw = jax.random.normal(k2, (2, 16, 256), dtype=jnp.float32)
    outw = jax.block_until_ready(balanced_basic_norm(xw, eps_param))
    refw = balanced_basic_norm_ref(xw, eps_param)
    assert outw.shape == xw.shape and outw.dtype == xw.dtype
    assert jnp.allclose(outw, refw, atol=1e-5, rtol=1e-5), "standard f32 mismatch"

    # 3) bf16 input (low-precision store branch), packed path.
    xb = jax.random.normal(k3, (2, 16, 32), dtype=jnp.float32).astype(jnp.bfloat16)
    outb = jax.block_until_ready(balanced_basic_norm(xb, eps_param))
    refb = balanced_basic_norm_ref(xb, eps_param)
    assert outb.dtype == jnp.bfloat16
    assert jnp.allclose(outb.astype(jnp.float32), refb.astype(jnp.float32),
                        atol=5e-2, rtol=5e-2), "bf16 mismatch"

    # 4) Tuple-input branch: embedding is passed through unchanged.
    out2, emb = balanced_basic_norm(x, eps_param, embedding=jnp.arange(4))
    jax.block_until_ready(out2)
    assert jnp.allclose(out2, ref, atol=1e-4, rtol=5e-3)
    assert emb.shape == (4,)

    print("KERNEL_OK")
</pallas_src>

<mosaic_0001>
module attributes {stable_mosaic.version = 11 : i64} {
  func.func @_basic_norm_packed_kernel(%arg0: i32, %arg1: memref<1xf32, #tpu.memory_space<smem>>, %arg2: memref<8x128xf32, #tpu.memory_space<vmem>>, %arg3: memref<128x128xf32, #tpu.memory_space<vmem>>, %arg4: memref<8x128xf32, #tpu.memory_space<vmem>>) attributes {dimension_semantics = [#tpu.dimension_semantics<parallel>], iteration_bounds = array<i64: 1>, scalar_prefetch = 0 : i64, scratch_operands = 0 : i64, tpu.core_type = #tpu.core_type<tc>, window_params = [{transform_indices = @transform_0, window_bounds = array<i64: 1>}, {transform_indices = @transform_1, window_bounds = array<i64: 8, 128>}, {pipeline_mode = #tpu.pipeline_mode<synchronous>, transform_indices = @transform_2, window_bounds = array<i64: 128, 128>}, {transform_indices = @transform_3, window_bounds = array<i64: 8, 128>}]} {
    %c0 = arith.constant 0 : index
    %c0_0 = arith.constant 0 : index
    %0 = vector.load %arg2[%c0, %c0_0] : memref<8x128xf32, #tpu.memory_space<vmem>>, vector<8x128xf32>
    %1 = arith.mulf %0, %0 : vector<8x128xf32>
    %c0_1 = arith.constant 0 : index
    %c0_2 = arith.constant 0 : index
    %2 = vector.load %arg3[%c0_1, %c0_2] : memref<128x128xf32, #tpu.memory_space<vmem>>, vector<128x128xf32>
    %cst = arith.constant dense<0.000000e+00> : vector<8x128xf32>
    %3 = tpu.matmul %1, %2, %cst {dimension_numbers = #tpu.dot_dimension_numbers<[1], [0], [0], [1], [0, 0, 1, 1], [], []>} : vector<8x128xf32>, vector<128x128xf32>, vector<8x128xf32> -> vector<8x128xf32>
    %c0_3 = arith.constant 0 : index
    %4 = memref.load %arg1[%c0_3] : memref<1xf32, #tpu.memory_space<smem>>
    %5 = vector.broadcast %4 : f32 to vector<8x128xf32>
    %6 = arith.addf %3, %5 : vector<8x128xf32>
    %7 = math.rsqrt %6 : vector<8x128xf32>
    %8 = arith.mulf %0, %7 : vector<8x128xf32>
    %c0_4 = arith.constant 0 : index
    %c0_5 = arith.constant 0 : index
    %9 = vector.load %arg4[%c0_4, %c0_5] : memref<8x128xf32, #tpu.memory_space<vmem>>, vector<8x128xf32>
    tpu.vector_store %arg4[%c0_4, %c0_5], %8 {strides = array<i32>} : memref<8x128xf32, #tpu.memory_space<vmem>>, vector<8x128xf32>,
    return
  }
  func.func @transform_0(%arg0: i32) -> i32 {
    %c0_i32 = arith.constant 0 : i32
    %c0_i32_0 = arith.constant 0 : i32
    return %c0_i32 : i32
  }
  func.func @transform_1(%arg0: i32) -> (i32, i32) {
    %c0_i32 = arith.constant 0 : i32
    %c0_i32_0 = arith.constant 0 : i32
    return %arg0, %c0_i32 : i32, i32
  }
  func.func @transform_2(%arg0: i32) -> (i32, i32) {
    %c0_i32 = arith.constant 0 : i32
    %c0_i32_0 = arith.constant 0 : i32
    %c0_i32_1 = arith.constant 0 : i32
    return %c0_i32, %c0_i32_0 : i32, i32
  }
  func.func @transform_3(%arg0: i32) -> (i32, i32) {
    %c0_i32 = arith.constant 0 : i32
    %c0_i32_0 = arith.constant 0 : i32
    return %arg0, %c0_i32 : i32, i32
  }
}

</mosaic_0001>

<bundles_post_ra>
// kernel: tpu_custom_call.1
= control target key start
LH: loop header
LB: loop body
LE: loop exit
PB: predicated region body
PF: predicated region fallthrough
CT: control target
= control target key end

     0   :  { %9 = vsyncpa [#allocation4], 0  ;;  %s383_s0 = inlined_call_operand.<no memory space> [shape: f32[1], index: 0, kind: input, shape index: {}]   ;;  %s384_s1 = inlined_call_operand.hbm [shape: f32[8,128], index: 1, kind: input, shape index: {}]   ;;  %s385_s2 = inlined_call_operand.hbm [shape: f32[128,128], index: 2, kind: input, shape index: {}]   ;;  %s386_s3 = inlined_call_operand.hbm [shape: f32[8,128], index: 3, kind: output, shape index: {}]  }
   0x1   :  { %10 = vsyncpa [#allocation7], 0 }
   0x2   :  { %11 = vsyncpa [#allocation5], 0  ;;  %s309_s12 = smov [#allocation3]   ;;  %s310_s14 = smov [#allocation6]  }
   0x3   :  { %s20_s13 = sshll.u32 %s309_s12, 4  ;;  %s29_s15 = sshll.u32 %s310_s14, 4  ;;  %s21_s13 = int_to_ptr.vmem [resolvable:$true] %s20_s13  ;;  %s337_s15 = int_to_ptr.vmem [resolvable:$true] %s29_s15 }
   0x4   :  { %s237_s18 = scalar_lea.hbm %s384_s1, 128 }
   0x5   :  { %p238_p0 = scmp.ne.s32.totalorder %s384_s1, %s237_s18  ;;  %p241_p1 = scmp.lt.u32.totalorder %s237_s18, %s384_s1 }
   0x7   :  { %p243_p2 = pnand %p241_p1, %p238_p0 }
   0x9   :  { %246 = shalt.err (!%p243_p2)
}
   0xa   :  { %s247_s23 = scalar_lea.vmem %s21_s13, 128  ;;  %p252_p4 = scmp.lt.s32.totalorder %s21_s13, %s21_s13 }
   0xb   :  { %p248_p3 = scmp.ne.s32.totalorder %s21_s13, %s247_s23  ;;  %p253_p5 = scmp.lt.s32.totalorder %s247_s23, %s247_s23 }
   0xd   :  { %p254_p6 = por %p253_p5, %p252_p4 }
   0xf   :  { %p255_p7 = pnand %p254_p6, %p248_p3 }
  0x11   :  { %258 = shalt.err (!%p255_p7)
}
  0x12   :  { %23 = dma.hbm_to_vmem [thread:$0]  %s384_s1, 128, %s21_s13, [#allocation4]  }
  0x13   :  { %s259_s28 = scalar_lea.hbm %s385_s2, 2048 }
  0x14   :  { %p260_p8 = scmp.ne.s32.totalorder %s385_s2, %s259_s28  ;;  %p263_p9 = scmp.lt.u32.totalorder %s259_s28, %s385_s2 }
  0x16   :  { %p265_p10 = pnand %p263_p9, %p260_p8 }
  0x18   :  { %268 = shalt.err (!%p265_p10)
}
  0x19   :  { %s269_s6 = scalar_lea.vmem %s337_s15, 2048  ;;  %p274_p12 = scmp.lt.s32.totalorder %s337_s15, %s337_s15 }
  0x1a   :  { %p270_p11 = scmp.ne.s32.totalorder %s337_s15, %s269_s6  ;;  %p275_p13 = scmp.lt.s32.totalorder %s269_s6, %s269_s6 }
  0x1c   :  { %p276_p0 = por %p275_p13, %p274_p12 }
  0x1e   :  { %p277_p1 = pnand %p276_p0, %p270_p11 }
  0x20   :  { %280 = shalt.err (!%p277_p1)
}
  0x21   :  { %s311_s1 = smov 128   ;;  %s312_s7 = smov 8  }
  0x22   :  { %35 = dma.hbm_to_vmem [thread:$0]  %s385_s2, 2048, %s337_s15, [#allocation7], %s311_s1, %s311_s1, %s312_s7  }
  0x23   :  { %303 = dma.done.wait [#allocation4], 128  }
  0x24   :  { %304 = vsyncadd [#allocation4], 4294967168 }
  0x25   :  { %305 = dma.done.wait [#allocation7], 2048  }
  0x26   :  { %306 = vsyncadd [#allocation7], 4294965248  ;;  %v313_v0 = vmov 0.0|0.0   ;;  %vm314_vm0 = vmmov 0   ;;  %v315_v1 = vmov 0.0   ;;  %v44_v2 = vld [vmem:[#allocation6] sm:$0xff]  ;;  %v61_v28 = vstv %s383_s0 }
  0x27   :  { %203 = vmatprep.subr.bf16.mxu0 %v313_v0  ;;  %200 = vmatprep.mubr.msk.f32.mxu0 %vm314_vm0, %v315_v1  ;;  %v45_v3 = vld [vmem:[#allocation6 + $0x8] sm:$0xff]  ;;  %v46_v4 = vld [vmem:[#allocation6 + $0x10] sm:$0xff]  ;;  %v47_v6 = vld [vmem:[#allocation6 + $0x18] sm:$0xff]  ;;  %s316_s11 = smov [#allocation8]  }
  0x28   :  { %v204_v5 = vpack.c.bf16 %v45_v3, %v44_v2  ;;  %v207_v7 = vpack.c.bf16 %v47_v6, %v46_v4  ;;  %v48_v8 = vld [vmem:[#allocation6 + $0x20] sm:$0xff]  ;;  %v49_v9 = vld [vmem:[#allocation6 + $0x28] sm:$0xff]  ;;  %v50_v11 = vld [vmem:[#allocation6 + $0x30] sm:$0xff]  ;;  %s141_s12 = sshll.u32 %s316_s11, 4  ;;  %s142_s12 = int_to_ptr.vmem [resolvable:$true] %s141_s12 }
  0x29   :  { %v210_v10 = vpack.c.bf16 %v49_v9, %v48_v8  ;;  %v51_v12 = vld [vmem:[#allocation6 + $0x38] sm:$0xff]  ;;  %v52_v14 = vld [vmem:[#allocation6 + $0x40] sm:$0xff]  ;;  %v53_v15 = vld [vmem:[#allocation6 + $0x48] sm:$0xff]  ;;  %s281_s13 = scalar_lea.vmem %s142_s12, 128  ;;  %p286_p3 = scmp.lt.s32.totalorder %s142_s12, %s142_s12 }
  0x2a   :  { %205 = vmatpush3.bf16.msra.mxu0 %v204_v5  ;;  %v213_v13 = vpack.c.bf16 %v51_v12, %v50_v11  ;;  %v216_v16 = vpack.c.bf16 %v53_v15, %v52_v14  ;;  %v54_v17 = vld [vmem:[#allocation6 + $0x50] sm:$0xff]  ;;  %v55_v18 = vld [vmem:[#allocation6 + $0x58] sm:$0xff]  ;;  %v56_v20 = vld [vmem:[#allocation6 + $0x60] sm:$0xff]  ;;  %p282_p2 = scmp.ne.s32.totalorder %s142_s12, %s281_s13  ;;  %p287_p4 = scmp.lt.s32.totalorder %s281_s13, %s281_s13 }
  0x2b   :  { %206 = vmatprep.subr.bf16.mxu0 %v313_v0  ;;  %v219_v19 = vpack.c.bf16 %v55_v18, %v54_v17  ;;  %v57_v21 = vld [vmem:[#allocation6 + $0x68] sm:$0xff]  ;;  %v58_v23 = vld [vmem:[#allocation6 + $0x70] sm:$0xff]  ;;  %v59_v24 = vld [vmem:[#allocation6 + $0x78] sm:$0xff] }
  0x2c   :  { %v222_v22 = vpack.c.bf16 %v57_v21, %v56_v20  ;;  %v225_v25 = vpack.c.bf16 %v59_v24, %v58_v23  ;;  %v42_v26 = vld [vmem:[#allocation3] sm:$0xff]  ;;  %p288_p5 = por %p287_p4, %p286_p3 }
  0x2d   :  { %v43_v27 = vmul.f32 %v42_v26, %v42_v26 }
  0x2e   :  { %208 = vmatpush3.bf16.msra.mxu0 %v207_v7  ;;  %p289_p6 = pnand %p288_p5, %p282_p2 }
  0x2f   :  { %209 = vmatprep.subr.bf16.mxu0 %v313_v0 }
  0x32   :  { %211 = vmatpush3.bf16.msra.mxu0 %v210_v10 }
  0x33   :  { %212 = vmatprep.subr.bf16.mxu0 %v313_v0 }
  0x36   :  { %214 = vmatpush3.bf16.msra.mxu0 %v213_v13 }
  0x37   :  { %215 = vmatprep.subr.bf16.mxu0 %v313_v0 }
  0x3a   :  { %217 = vmatpush3.bf16.msra.mxu0 %v216_v16 }
  0x3b   :  { %218 = vmatprep.subr.bf16.mxu0 %v313_v0 }
  0x3e   :  { %220 = vmatpush3.bf16.msra.mxu0 %v219_v19 }
  0x3f   :  { %221 = vmatprep.subr.bf16.mxu0 %v313_v0 }
  0x42   :  { %223 = vmatpush3.bf16.msra.mxu0 %v222_v22 }
  0x43   :  { %224 = vmatprep.subr.bf16.mxu0 %v313_v0 }
  0x46   :  { %226 = vmatpush3.bf16.msra.mxu0 %v225_v25 }
  0x49   :  { %201 = vmatmul.mubr.f32.vlgmr.msra.gmra.mrb[0].mxu0 %v43_v27 }
 0x11c   :  { %v128_v29 = vpop.f32.mrb[0].mxu0 }
 0x11d   :  { %v129_v30 = vadd.f32 %v128_v29, %v61_v28  ;;  %v202_v31 = vpop.f32.mrb[1].mxu0 }
 0x11f   :  { %235 = vrsqrt.f32 %v129_v30 }
 0x129   :  { %v236_v32 = vpop.eup %235 }
 0x12a   :  { %v133_v33 = vmul.f32 %v236_v32, %v42_v26 }
 0x12c   :  { %134 = vst [vmem:[#allocation8] sm:$0xff] %v133_v33 }
 0x12d   :  { %292 = shalt.err (!%p289_p6)
}
 0x12e   :  { %s293_s0 = scalar_lea.hbm %s386_s3, 128 }
 0x12f   :  { %p294_p7 = scmp.ne.s32.totalorder %s386_s3, %s293_s0  ;;  %p297_p8 = scmp.lt.u32.totalorder %s293_s0, %s386_s3 }
 0x131   :  { %p299_p9 = pnand %p297_p8, %p294_p7 }
 0x133   :  { %302 = shalt.err (!%p299_p9)
}
 0x134   :  { %144 = dma.vmem_to_hbm [thread:$0]  %s142_s12, 128, %s386_s3, [#allocation5]  }
 0x135   :  { %307 = dma.done.wait [#allocation5], 128  }
 0x136   :  { %308 = vsyncadd [#allocation5], 4294967168 }
 0x137   :  { %148 = vsyncpa [#allocation4], 1 }
 0x138   :  { %149 = vsyncpa [#allocation7], 1 }
 0x139   :  { %150 = vsyncpa [#allocation5], 1 }

</bundles_post_ra>
